<compile_context>
chip_gen: v7x
topology: tpu7x:2x2x1
jax: 0.10.0
libtpu: 0.0.40
codegen_flags: <defaults>
</compile_context>

<pallas_src>
import functools
import math

import jax
import jax.numpy as jnp
from jax import lax
from jax.experimental import pallas as pl
from jax.experimental.pallas import tpu as pltpu

_VMEM_LIMIT_BYTES = 64 * 1024 * 1024


def _mosaic(*sem):
    return pltpu.CompilerParams(dimension_semantics=sem,
                                vmem_limit_bytes=_VMEM_LIMIT_BYTES)


# ----------------------------------------------------------------------------
# Tile-size helpers (128/256-multiples preferred; fall back to full extent)
# ----------------------------------------------------------------------------
def _pick_row_tile(m):
    for t in (256, 128):
        if m % t == 0:
            return t
    if m <= 256:
        return m          # single full-extent block
    return 256            # ragged edge handled by Pallas masking (256 % 8 == 0)


def _pick_out_tile(dout):
    for t in (512, 256, 128):
        if dout % t == 0:
            return t
    return dout            # full extent (small / irregular Dout)


def _pick_seq_tile(s):
    for t in (256, 128):
        if s % t == 0:
            return t
    return s                # full extent -> grid of 1 along that axis


def _pick_kv_chunk(s):
    for t in (512, 256, 128):
        if s % t == 0:
            return t
    return s


def _pick_kred_tile(d):
    for t in (512, 256, 128):
        if d % t == 0:
            return t
    return d


# ----------------------------------------------------------------------------
# Kernel 1: linear + bias (shared by fused-QKV and stacked-QKV projections).
#   x, w arrive pre-cast bf16; accumulate f32 on the MXU; emit bf16.
# ----------------------------------------------------------------------------
def _linear_bias_kernel(x_ref, w_ref, b_ref, o_ref):
    y = jnp.dot(x_ref[...], w_ref[...], preferred_element_type=jnp.float32)
    o_ref[...] = (y + b_ref[...]).astype(o_ref.dtype)


def fused_qkv_projection(x2d, w_qkv, b_qkv):
    """Self-attention fast path: y = x @ [w_q|w_k|w_v] + b, x read once."""
    M, Din = x2d.shape
    Dout = w_qkv.shape[1]
    tm = _pick_row_tile(M)
    tn = _pick_out_tile(Dout)
    # TODO(synk): consider pipeline_mode=pl.Buffered(3) on the x stream once a
    # profile shows exposed DMA at large M.
    return pl.pallas_call(
        _linear_bias_kernel,
        out_shape=jax.ShapeDtypeStruct((M, Dout), jnp.bfloat16),
        grid=(pl.cdiv(Dout, tn), pl.cdiv(M, tm)),   # weight col-block resident over inner i
        in_specs=[
            pl.BlockSpec((tm, Din), lambda j, i: (i, 0)),
            pl.BlockSpec((Din, tn), lambda j, i: (0, j)),
            pl.BlockSpec((1, tn), lambda j, i: (0, j)),
        ],
        out_specs=pl.BlockSpec((tm, tn), lambda j, i: (i, j)),
        compiler_params=_mosaic("parallel", "parallel"),
    )(x2d, w_qkv, b_qkv)


def stacked_qkv_projection(x_stack, w_stack, b_stack):
    """Cross-attention path: out[p] = x[p] @ w[p] + b[p] for p in {q,k,v}."""
    P, M, Din = x_stack.shape
    Dout = w_stack.shape[2]
    tm = _pick_row_tile(M)
    tn = _pick_out_tile(Dout)
    return pl.pallas_call(
        _linear_bias_kernel,
        out_shape=jax.ShapeDtypeStruct((P, M, Dout), jnp.bfloat16),
        grid=(P, pl.cdiv(Dout, tn), pl.cdiv(M, tm)),
        in_specs=[
            pl.BlockSpec((None, tm, Din), lambda p, j, i: (p, i, 0)),
            pl.BlockSpec((None, Din, tn), lambda p, j, i: (p, 0, j)),
            pl.BlockSpec((None, 1, tn), lambda p, j, i: (p, 0, j)),
        ],
        out_specs=pl.BlockSpec((None, tm, tn), lambda p, j, i: (p, i, j)),
        compiler_params=_mosaic("parallel", "parallel", "parallel"),
    )(x_stack, w_stack, b_stack)


# ----------------------------------------------------------------------------
# Kernel 2: flash-style scaled-dot-product attention (online softmax).
#   grid = (B, H, S//TQ); the full-S K/V block per (b, h) is resident (its
#   block index does not change across the inner q axis, so it is DMA'd once
#   per head); the KV sweep is an in-kernel loop over TK chunks.
#   Q arrives pre-scaled (1/sqrt(n_d) folded into w_q/b_q) and already bf16.
# ----------------------------------------------------------------------------
def _flash_attn_kernel(q_ref, k_ref, v_ref, o_ref, m_sc, l_sc, acc_sc, *, tk, nk):
    m_sc[...] = jnp.full_like(m_sc, -jnp.inf)
    l_sc[...] = jnp.zeros_like(l_sc)
    acc_sc[...] = jnp.zeros_like(acc_sc)

    q = q_ref[...]                                   # (TQ, Nd) bf16, pre-scaled

    # TODO(synk): mask=None path only; masked_fill branch not implemented
    # (module forward is exercised with mask=None). Dropout is eval-mode identity.
    @pl.loop(0, nk)
    def _(step):
        start = pl.multiple_of(step * tk, tk)
        k = k_ref[pl.ds(start, tk), :]               # (TK, Nd) bf16
        v = v_ref[pl.ds(start, tk), :]               # (TK, Nd) bf16
        # Q @ K^T without materializing a transpose: contract the last dims.
        s = lax.dot_general(q, k, (((1,), (1,)), ((), ())),
                            preferred_element_type=jnp.float32)   # (TQ, TK) f32
        m_prev = m_sc[...]
        m_new = jnp.maximum(m_prev, jnp.max(s, axis=-1, keepdims=True))
        alpha = jnp.exp(m_prev - m_new)
        p = jnp.exp(s - m_new)
        l_sc[...] = alpha * l_sc[...] + jnp.sum(p, axis=-1, keepdims=True)
        acc_sc[...] = alpha * acc_sc[...] + jnp.dot(
            p.astype(jnp.bfloat16), v, preferred_element_type=jnp.float32)
        m_sc[...] = m_new

    inv_l = pl.reciprocal(l_sc[...], approx=True)    # EUP slot, VALU stays free
    o_ref[...] = (acc_sc[...] * inv_l).astype(o_ref.dtype)


def _flash_scratch(tq, nd):
    return [
        pltpu.VMEM((tq, 1), jnp.float32),    # running max
        pltpu.VMEM((tq, 1), jnp.float32),    # running denom
        pltpu.VMEM((tq, nd), jnp.float32),   # running output accumulator
    ]


def flash_attention_heads(q, k, v):
    """Explicit-heads layout: q/k/v are (B, H, S, Nd) bf16 (any Nd)."""
    B, H, S, Nd = q.shape
    tq = _pick_seq_tile(S)
    tk = _pick_kv_chunk(S)
    kernel = functools.partial(_flash_attn_kernel, tk=tk, nk=S // tk)
    q_spec = pl.BlockSpec((None, None, tq, Nd), lambda b, h, qi: (b, h, qi, 0))
    kv_spec = pl.BlockSpec((None, None, S, Nd), lambda b, h, qi: (b, h, 0, 0))
    # TODO(synk): for Nd < 128 (lane-sparse), pack 2+ heads per grid step to
    # restore 128-lane density on v6e/v7x.
    return pl.pallas_call(
        kernel,
        out_shape=jax.ShapeDtypeStruct((B, H, S, Nd), jnp.bfloat16),
        grid=(B, H, S // tq),
        in_specs=[q_spec, kv_spec, kv_spec],
        out_specs=pl.BlockSpec((None, None, tq, Nd), lambda b, h, qi: (b, h, qi, 0)),
        scratch_shapes=_flash_scratch(tq, Nd),
        compiler_params=_mosaic("parallel", "parallel", "parallel"),
    )(q, k, v)


def flash_attention_folded(q, k, v, n_head, n_d):
    """Head-folded layout (n_d % 128 == 0): q/k/v and the output stay (B, S, D);
    each grid step reads/writes the h-th n_d-wide lane chunk directly, so no
    split_heads / merge transposes and the output store is lane-dense."""
    B, S, D = q.shape
    tq = _pick_seq_tile(S)
    tk = _pick_kv_chunk(S)
    kernel = functools.partial(_flash_attn_kernel, tk=tk, nk=S // tk)
    q_spec = pl.BlockSpec((None, tq, n_d), lambda b, h, qi: (b, qi, h))
    kv_spec = pl.BlockSpec((None, S, n_d), lambda b, h, qi: (b, 0, h))
    return pl.pallas_call(
        kernel,
        out_shape=jax.ShapeDtypeStruct((B, S, D), jnp.bfloat16),
        grid=(B, n_head, S // tq),
        in_specs=[q_spec, kv_spec, kv_spec],
        out_specs=pl.BlockSpec((None, tq, n_d), lambda b, h, qi: (b, qi, h)),
        scratch_shapes=_flash_scratch(tq, n_d),
        compiler_params=_mosaic("parallel", "parallel", "parallel"),
    )(q, k, v)


# ----------------------------------------------------------------------------
# Kernel 3: output projection + (dropout=identity) + residual + LayerNorm.
#   grid = (M//tm, D//tkr): K-reduction over tkr-wide weight slabs into an f32
#   VMEM accumulator; bias/residual/LN applied at the last K step.
# ----------------------------------------------------------------------------
def _out_proj_ln_kernel(a_ref, wo_ref, bo_ref, res_ref, g_ref, beta_ref, o_ref,
                        acc_ref, *, eps):
    kk = pl.program_id(1)

    @pl.when(kk == 0)
    def _():
        acc_ref[...] = jnp.zeros_like(acc_ref)

    acc_ref[...] += jnp.dot(a_ref[...], wo_ref[...],
                            preferred_element_type=jnp.float32)

    @pl.when(kk == pl.num_programs(1) - 1)
    def _():
        # TODO(synk): nn.Dropout(p=0.1) is identity here (inference semantics).
        y = acc_ref[...] + bo_ref[...] + res_ref[...].astype(jnp.float32)
        mean = jnp.mean(y, axis=-1, keepdims=True)
        var = jnp.mean((y - mean) ** 2, axis=-1, keepdims=True)
        norm = (y - mean) * lax.rsqrt(var + eps)
        o_ref[...] = (norm * g_ref[...] + beta_ref[...]).astype(o_ref.dtype)


def out_proj_residual_layernorm(attn2d, wo, bo, residual2d, gamma, beta, eps=1e-5):
    M, D = residual2d.shape
    Din = attn2d.shape[1]
    tm = _pick_row_tile(M)
    tkr = _pick_kred_tile(Din)
    kernel = functools.partial(_out_proj_ln_kernel, eps=eps)
    return pl.pallas_call(
        kernel,
        out_shape=jax.ShapeDtypeStruct((M, D), residual2d.dtype),
        grid=(pl.cdiv(M, tm), Din // tkr),
        in_specs=[
            pl.BlockSpec((tm, tkr), lambda i, kk: (i, kk)),   # bf16 attn stream
            pl.BlockSpec((tkr, D), lambda i, kk: (kk, 0)),    # bf16 weight slab
            pl.BlockSpec((1, D), lambda i, kk: (0, 0)),
            pl.BlockSpec((tm, D), lambda i, kk: (i, 0)),      # f32 residual (fetched once per i)
            pl.BlockSpec((1, D), lambda i, kk: (0, 0)),
            pl.BlockSpec((1, D), lambda i, kk: (0, 0)),
        ],
        out_specs=pl.BlockSpec((tm, D), lambda i, kk: (i, 0)),
        scratch_shapes=[pltpu.VMEM((tm, D), jnp.float32)],
        compiler_params=_mosaic("parallel", "arbitrary"),
    )(attn2d, wo, bo, residual2d, gamma, beta)


# ----------------------------------------------------------------------------
# One-time parameter preparation (bf16 weight casts, 1/sqrt(n_d) fold, fusion)
# ----------------------------------------------------------------------------
def prepare_params(params, n_head):
    D = params["w_q"].shape[0]
    n_d = D // n_head
    scale = 1.0 / math.sqrt(n_d)
    w_q_s = params["w_q"] * scale          # fold softmax scale in f32 first
    b_q_s = params["b_q"] * scale
    return {
        "n_head": n_head,
        "n_d": n_d,
        "d_model": D,
        # self-attention fast path: fused (D, 3D) weight, built once
        "w_qkv": jnp.concatenate([w_q_s, params["w_k"], params["w_v"]],
                                 axis=1).astype(jnp.bfloat16),
        "b_qkv": jnp.concatenate([b_q_s, params["b_k"], params["b_v"]],
                                 axis=0).reshape(1, 3 * D).astype(jnp.float32),
        # general path: stacked (3, D, D) weight
        "w_stack": jnp.stack([w_q_s, params["w_k"], params["w_v"]],
                             axis=0).astype(jnp.bfloat16),
        "b_stack": jnp.stack([b_q_s, params["b_k"], params["b_v"]],
                             axis=0).reshape(3, 1, D).astype(jnp.float32),
        "w_o": params["w_o"].astype(jnp.bfloat16),
        "b_o": params["b_o"].reshape(1, D).astype(jnp.float32),
        "ln_gamma": params["ln_gamma"].reshape(1, D).astype(jnp.float32),
        "ln_beta": params["ln_beta"].reshape(1, D).astype(jnp.float32),
    }


# ----------------------------------------------------------------------------
# Full module forward (glue in plain JAX, hot paths in the Pallas kernels above)
# ----------------------------------------------------------------------------
def multi_head_attention_forward(prep, x_q, x_k, x_v):
    B, S, D = x_q.shape
    H, Nd = prep["n_head"], prep["n_d"]
    residual2d = x_q.reshape(B * S, D)     # kept f32 for the LayerNorm path

    if (x_k is x_q) and (x_v is x_q):
        # Self-attention fast path: one fused (D, 3D) matmul, x read once.
        xq_bf = x_q.reshape(B * S, D).astype(jnp.bfloat16)
        qkv = fused_qkv_projection(xq_bf, prep["w_qkv"], prep["b_qkv"])   # (B*S, 3D) bf16
        q2d, k2d, v2d = qkv[:, :D], qkv[:, D:2 * D], qkv[:, 2 * D:]
    else:
        # General path: all three projections in a single stacked pallas_call.
        x_stack = jnp.stack(
            [x_q.reshape(B * S, D), x_k.reshape(B * S, D), x_v.reshape(B * S, D)],
            axis=0).astype(jnp.bfloat16)
        qkv = stacked_qkv_projection(x_stack, prep["w_stack"], prep["b_stack"])
        q2d, k2d, v2d = qkv[0], qkv[1], qkv[2]                            # (B*S, D) bf16

    if Nd % 128 == 0:
        # Head layout folded into the attention BlockSpecs: no transposes,
        # lane-dense stores.
        attn_bsd = flash_attention_folded(q2d.reshape(B, S, D),
                                          k2d.reshape(B, S, D),
                                          v2d.reshape(B, S, D), H, Nd)
        attn2d = attn_bsd.reshape(B * S, D)
    else:
        # Small/odd head dims: explicit (cheap, bf16) head split/merge.
        def split_heads(t2d):
            return t2d.reshape(B, S, H, Nd).transpose(0, 2, 1, 3)

        attn = flash_attention_heads(split_heads(q2d), split_heads(k2d),
                                     split_heads(v2d))                    # (B,H,S,Nd) bf16
        attn2d = attn.transpose(0, 2, 1, 3).reshape(B * S, D)

    out2d = out_proj_residual_layernorm(
        attn2d, prep["w_o"], prep["b_o"], residual2d,
        prep["ln_gamma"], prep["ln_beta"])
    return out2d.reshape(B, S, D)


# ----------------------------------------------------------------------------
# Parameter init (matches PyTorch nn.Linear default init range) & pure-JAX ref
# ----------------------------------------------------------------------------
def init_params(key, d_model):
    ks = jax.random.split(key, 8)
    bound = 1.0 / math.sqrt(d_model)

    def w(k):
        return jax.random.uniform(k, (d_model, d_model), jnp.float32, -bound, bound)

    def b(k):
        return jax.random.uniform(k, (d_model,), jnp.float32, -bound, bound)

    return {
        "w_q": w(ks[0]), "b_q": b(ks[1]),
        "w_k": w(ks[2]), "b_k": b(ks[3]),
        "w_v": w(ks[4]), "b_v": b(ks[5]),
        "w_o": w(ks[6]), "b_o": b(ks[7]),
        "ln_gamma": jnp.ones((d_model,), jnp.float32),
        "ln_beta": jnp.zeros((d_model,), jnp.float32),
    }


def reference_forward(params, x_q, x_k, x_v, n_head, eps=1e-5):
    B, S, D = x_q.shape
    nd = D // n_head

    def lin(x, w, b):
        return x @ w + b

    def heads(t):
        return t.reshape(B, S, n_head, nd).transpose(0, 2, 1, 3)

    q = heads(lin(x_q, params["w_q"], params["b_q"]))
    k = heads(lin(x_k, params["w_k"], params["b_k"]))
    v = heads(lin(x_v, params["w_v"], params["b_v"]))
    s = jnp.einsum("bhqd,bhkd->bhqk", q, k) / math.sqrt(nd)
    p = jax.nn.softmax(s, axis=-1)
    a = jnp.einsum("bhqk,bhkd->bhqd", p, v).transpose(0, 2, 1, 3).reshape(B, S, D)
    y = a @ params["w_o"] + params["b_o"] + x_q
    mu = jnp.mean(y, axis=-1, keepdims=True)
    var = jnp.mean((y - mu) ** 2, axis=-1, keepdims=True)
    return (y - mu) * lax.rsqrt(var + eps) * params["ln_gamma"] + params["ln_beta"]


if __name__ == "__main__":
    key = jax.random.PRNGKey(0)
    k_params, k_q, k_k, k_v, k_params2, k_x2 = jax.random.split(key, 6)

    # --- small shapes, Nd = 8 (explicit-heads attention layout) ---
    B, S, D, H = 2, 8, 32, 4
    params = init_params(k_params, D)
    prep = prepare_params(params, H)
    x_q = jax.random.normal(k_q, (B, S, D), jnp.float32)
    x_k = jax.random.normal(k_k, (B, S, D), jnp.float32)
    x_v = jax.random.normal(k_v, (B, S, D), jnp.float32)

    # Cross-attention path (stacked QKV projection).
    out = multi_head_attention_forward(prep, x_q, x_k, x_v)
    jax.block_until_ready(out)
    assert out.shape == (B, S, D), out.shape
    assert bool(jnp.all(jnp.isfinite(out))), "non-finite output (cross-attention)"
    ref = reference_forward(params, x_q, x_k, x_v, H)
    err = float(jnp.max(jnp.abs(out - ref)))
    assert err < 0.1, f"cross-attention mismatch vs reference: max abs err {err}"

    # Self-attention path (fused (D, 3D) QKV projection).
    out_self = multi_head_attention_forward(prep, x_q, x_q, x_q)
    jax.block_until_ready(out_self)
    assert out_self.shape == (B, S, D), out_self.shape
    ref_self = reference_forward(params, x_q, x_q, x_q, H)
    err_self = float(jnp.max(jnp.abs(out_self - ref_self)))
    assert err_self < 0.1, f"self-attention mismatch vs reference: max abs err {err_self}"

    # --- Nd = 128: head-folded attention layout (no split/merge transposes) ---
    B2, S2, D2, H2 = 2, 16, 256, 2
    params2 = init_params(k_params2, D2)
    prep2 = prepare_params(params2, H2)
    x2 = jax.random.normal(k_x2, (B2, S2, D2), jnp.float32)
    out2 = multi_head_attention_forward(prep2, x2, x2, x2)
    jax.block_until_ready(out2)
    assert out2.shape == (B2, S2, D2), out2.shape
    assert bool(jnp.all(jnp.isfinite(out2))), "non-finite output (folded heads)"
    ref2 = reference_forward(params2, x2, x2, x2, H2)
    err2 = float(jnp.max(jnp.abs(out2 - ref2)))
    assert err2 < 0.15, f"folded-head self-attention mismatch: max abs err {err2}"

    print("KERNEL_OK")
</pallas_src>

<mosaic_0001>
module attributes {stable_mosaic.version = 11 : i64} {
  func.func @_linear_bias_kernel(%arg0: i32, %arg1: i32, %arg2: i32, %arg3: memref<1x16x32xbf16, #tpu.memory_space<vmem>>, %arg4: memref<1x32x32xbf16, #tpu.memory_space<vmem>>, %arg5: memref<1x1x32xf32, #tpu.memory_space<vmem>>, %arg6: memref<1x16x32xbf16, #tpu.memory_space<vmem>>) attributes {dimension_semantics = [#tpu.dimension_semantics<parallel>, #tpu.dimension_semantics<parallel>, #tpu.dimension_semantics<parallel>], iteration_bounds = array<i64: 3, 1, 1>, scalar_prefetch = 0 : i64, scratch_operands = 0 : i64, tpu.core_type = #tpu.core_type<tc>, window_params = [{transform_indices = @transform_0, window_bounds = array<i64: 1, 16, 32>}, {transform_indices = @transform_1, window_bounds = array<i64: 1, 32, 32>}, {transform_indices = @transform_2, window_bounds = array<i64: 1, 1, 32>}, {transform_indices = @transform_3, window_bounds = array<i64: 1, 16, 32>}]} {
    %c0 = arith.constant 0 : index
    %c0_0 = arith.constant 0 : index
    %c0_1 = arith.constant 0 : index
    %0 = vector.load %arg3[%c0, %c0_0, %c0_1] : memref<1x16x32xbf16, #tpu.memory_space<vmem>>, vector<1x16x32xbf16>
    %1 = vector.shape_cast %0 : vector<1x16x32xbf16> to vector<16x32xbf16>
    %c0_2 = arith.constant 0 : index
    %c0_3 = arith.constant 0 : index
    %c0_4 = arith.constant 0 : index
    %2 = vector.load %arg4[%c0_2, %c0_3, %c0_4] : memref<1x32x32xbf16, #tpu.memory_space<vmem>>, vector<1x32x32xbf16>
    %3 = vector.shape_cast %2 : vector<1x32x32xbf16> to vector<32x32xbf16>
    %cst = arith.constant dense<0.000000e+00> : vector<16x32xf32>
    %4 = tpu.matmul %1, %3, %cst {dimension_numbers = #tpu.dot_dimension_numbers<[1], [0], [0], [1], [0, 0, 1, 1], [], []>} : vector<16x32xbf16>, vector<32x32xbf16>, vector<16x32xf32> -> vector<16x32xf32>
    %c0_5 = arith.constant 0 : index
    %c0_6 = arith.constant 0 : index
    %c0_7 = arith.constant 0 : index
    %5 = vector.load %arg5[%c0_5, %c0_6, %c0_7] : memref<1x1x32xf32, #tpu.memory_space<vmem>>, vector<1x1x32xf32>
    %6 = vector.shape_cast %5 : vector<1x1x32xf32> to vector<1x32xf32>
    %7 = vector.broadcast %6 : vector<1x32xf32> to vector<16x32xf32>
    %8 = arith.addf %4, %7 : vector<16x32xf32>
    %9 = arith.truncf %8 : vector<16x32xf32> to vector<16x32xbf16>
    %c0_8 = arith.constant 0 : index
    %c0_9 = arith.constant 0 : index
    %c0_10 = arith.constant 0 : index
    %10 = vector.load %arg6[%c0_8, %c0_9, %c0_10] : memref<1x16x32xbf16, #tpu.memory_space<vmem>>, vector<1x16x32xbf16>
    %11 = vector.shape_cast %10 : vector<1x16x32xbf16> to vector<16x32xbf16>
    %12 = vector.shape_cast %9 : vector<16x32xbf16> to vector<1x16x32xbf16>
    tpu.vector_store %arg6[%c0_8, %c0_9, %c0_10], %12 {strides = array<i32>} : memref<1x16x32xbf16, #tpu.memory_space<vmem>>, vector<1x16x32xbf16>,
    return
  }
  func.func @transform_0(%arg0: i32, %arg1: i32, %arg2: i32) -> (i32, i32, i32) {
    %c0_i32 = arith.constant 0 : i32
    %c0_i32_0 = arith.constant 0 : i32
    return %arg0, %arg2, %c0_i32 : i32, i32, i32
  }
  func.func @transform_1(%arg0: i32, %arg1: i32, %arg2: i32) -> (i32, i32, i32) {
    %c0_i32 = arith.constant 0 : i32
    %c0_i32_0 = arith.constant 0 : i32
    return %arg0, %c0_i32, %arg1 : i32, i32, i32
  }
  func.func @transform_2(%arg0: i32, %arg1: i32, %arg2: i32) -> (i32, i32, i32) {
    %c0_i32 = arith.constant 0 : i32
    %c0_i32_0 = arith.constant 0 : i32
    return %arg0, %c0_i32, %arg1 : i32, i32, i32
  }
  func.func @transform_3(%arg0: i32, %arg1: i32, %arg2: i32) -> (i32, i32, i32) {
    %c0_i32 = arith.constant 0 : i32
    return %arg0, %arg2, %arg1 : i32, i32, i32
  }
}

</mosaic_0001>

<bundles_post_ra>
// kernel: tpu_custom_call.1
= control target key start
LH: loop header
LB: loop body
LE: loop exit
PB: predicated region body
PF: predicated region fallthrough
CT: control target
= control target key end

     0   :  { %s1119_s0 = inlined_call_operand.hbm [shape: bf16[3,16,32], index: 0, kind: input, shape index: {}]   ;;  %s1120_s1 = inlined_call_operand.hbm [shape: bf16[3,32,32], index: 1, kind: input, shape index: {}]   ;;  %s1121_s2 = inlined_call_operand.hbm [shape: f32[3,1,32], index: 2, kind: input, shape index: {}]   ;;  %s1122_s3 = inlined_call_operand.hbm [shape: bf16[3,16,32], index: 3, kind: output, shape index: {}]  }
   0x1   :  { %1129 = sst [smem:[#allocation13_spill]] %s1119_s0 }
   0x2   :  { %1130 = sst [smem:[#allocation14_spill]] %s1120_s1 }
   0x3   :  { %8 = vsyncpa [#allocation3], 0 }
   0x4   :  { %10 = vsyncpa [#allocation3 + $0x1], 0 }
   0x5   :  { %11 = vsyncpa [#allocation6], 0 }
   0x6   :  { %13 = vsyncpa [#allocation6 + $0x1], 0 }
   0x7   :  { %14 = vsyncpa [#allocation4], 0 }
   0x8   :  { %16 = vsyncpa [#allocation4 + $0x1], 0  ;;  %s865_s12 = smov 0   ;;  %s867_s13 = smov 0  }
   0x9   :  { %s869_s14 = smov 0   ;;  %s871_s15 = smov 0  }
   0xa   :  { %s873_s16 = smov 0   ;;  %s875_s17 = smov 0  }
   0xb LB: > { %s896_s18 = sadd.s32 4294967295, %s833_s17   ;;  %s534_s19 = sadd.s32 4294967294, %s833_s17   ;;  %s833_s17 = sphi %s875_s17, %s22_s17   ;;  %s829_s16 = sphi %s873_s16, %s1152_s16   ;;  %s825_s15 = sphi %s871_s15, %s1151_s15   ;;  %s821_s14 = sphi %s869_s14, %s1150_s14   ;;  %s817_s13 = sphi %s867_s13, %s1149_s13   ;;  %s813_s12 = sphi %s865_s12, %s1148_s12  }
   0xc   : > { %s41_s20 = sadd.s32 1, %s829_s16  ;;  %s50_s21 = sadd.s32 1, %s821_s14 }
   0xd   : > { %p43_p0 = scmp.ge.s32.totalorder %s41_s20, 3  ;;  %p57_p1 = scmp.ne.s32.totalorder %s821_s14, %s817_s13 }
   0xe   : > { %p58_p2 = scmp.eq.s32.totalorder %s833_s17, 0  ;;  %p63_p3 = scmp.ne.s32.totalorder %s817_s13, %s813_s12 }
   0xf   : > { %s1154_s20 = smov (%p43_p0, %s41_s20), 0  ;;  %p64_p5 = scmp.eq.s32.totalorder %s896_s18, 0 }
  0x10   : > { %1131 = sst [smem:[#allocation12_spill]] %s1154_s20  ;;  %p59_p4 = por %p58_p2, %p57_p1 }
  0x11   : > { %s45_s22 = ssub.s32 %s829_s16, %s1154_s20  ;;  %p147_p6 = scmp.eq.s32.totalorder %s896_s18, 2 }
  0x12   : > { %p48_p7 = scmp.eq.s32.totalorder %s45_s22, 0  ;;  %p912_p8 = por %p64_p5, %p63_p3 }
  0x13   : > { %p916_p9 = por %p147_p6, %p57_p1  ;;  %p153_p10 = scmp.eq.s32.totalorder %s534_s19, 2 }
  0x14   : > { %s1132_s23 = scalar_select %p912_p8, 1, 0 }
  0x15   : > { %s1133_s24 = scalar_select %p916_p9, 1, 0 }
  0x16   : > { %s921_s25 = scalar_select %p48_p7, %s821_s14, %s50_s21  }
  0x17   : > { %p923_p11 = por %p153_p10, %p63_p3  ;;  %p598_p12 = scmp.lt.s32.totalorder %s833_s17, 3 }
  0x18   : > { %s929_s27 = sand.u32 1, %s821_s14   ;;  %s196_s29 = sand.u32 1, %s833_s17  }
  0x19   : > { %s1134_s26 = scalar_select %p923_p11, 1, 0 }
  0x1a   : > { %p931_p13 = pnand %p598_p12, %p59_p4  ;;  %s540_s30 = sshll.u32 %s929_s27, 4 }
  0x1b   : > { %s561_s4 = sshll.u32 %s829_s16, 8  ;;  %s200_s5 = scalar_lea.vmem [#allocation5], %s540_s30 }
  0x1c   : > { %s1135_s28 = scalar_select %p931_p13, 1, 0 }
  0x1d   : > { %s208_s6 = sshll.u32 %s200_s5, 4  ;;  %s1136_s1 = sld [smem:[#allocation14_spill]]  ;;  %s943_s6 = int_to_ptr.vmem [resolvable:$true] %s208_s6 }
  0x1e   : > { %s945_s10 = scalar_lea.sflag [#allocation6], %s196_s29  ;;  %p951_p1 = pneg %p931_p13 }
  0x23   : > { %s941_s9 = scalar_lea.hbm %s1136_s1, %s561_s4  ;;  %s662_s30 = scalar_lea.hbm %s1136_s1, 768 }
  0x24   : > { %s657_s11 = scalar_lea.hbm %s941_s9, 256  ;;  %p663_p4 = scmp.lt.u32.totalorder %s941_s9, %s1136_s1 }
  0x25   : > { %p658_p0 = scmp.ne.s32.totalorder %s941_s9, %s657_s11  ;;  %p664_p5 = scmp.lt.u32.totalorder %s662_s30, %s657_s11 }
  0x26   : > { %p666_p7 = scmp.lt.u32.totalorder %s657_s11, %s941_s9 }
  0x27   : > { %p660_p2 = pnand %p951_p1, %p658_p0  ;;  %p665_p6 = por %p664_p5, %p663_p4 }
  0x29   : > { %p661_p3 = pneg %p660_p2  ;;  %p667_p10 = por %p666_p7, %p665_p6 }
  0x2b   : > { %p668_p12 = pnand %p667_p10, %p661_p3 }
  0x2d   : > { %671 = shalt.err (!%p668_p12)
}
  0x2e   : > { %s672_s29 = scalar_lea.vmem %s943_s6, 256  ;;  %s835_s7 = smov [#allocation5]  }
  0x2f   : > { %p673_p0 = scmp.ne.s32.totalorder %s943_s6, %s672_s29  ;;  %s677_s8 = sshll.u32 %s835_s7, 4  ;;  %s678_s8 = int_to_ptr.vmem [resolvable:$false] %s677_s8 }
  0x30   : > { %s679_s21 = scalar_lea.vmem %s678_s8, 512  ;;  %p680_p9 = scmp.lt.s32.totalorder %s943_s6, %s678_s8 }
  0x31   : > { %p675_p2 = pnand %p673_p0, %p951_p1  ;;  %p681_p8 = scmp.lt.s32.totalorder %s679_s21, %s672_s29 }
  0x33   : > { %p676_p11 = pneg %p675_p2  ;;  %p682_p4 = por %p681_p8, %p680_p9 }
  0x35   : > { %p683_p5 = pnand %p682_p4, %p676_p11 }
  0x37   : > { %686 = shalt.err (!%p683_p5)
}
  0x38   : > { %s1125_s11 = smov 64   ;;  %s1126_s22 = smov 4  }
  0x39   : > { %590 = dma.hbm_to_vmem [thread:$0]  (!%p931_p13), %s941_s9, 256, %s943_s6, %s945_s10, %s1125_s11, %s1125_s11, %s1126_s22  }
  0x3a   : > { %p544_p8 = scmp.ge.s32.totalorder %s833_s17, 1  ;;  %p234_p9 = scmp.lt.s32.totalorder %s833_s17, 4 }
  0x3b   : > { %s537_s4 = sshll.u32 %s929_s27, 3  ;;  %s560_s5 = sshll.u32 %s829_s16, 7 }
  0x3c   : > { %p980_p11 = pnand %p544_p8, %p234_p9  ;;  %s1139_s0 = sld [smem:[#allocation13_spill]] }
  0x3d   : > { %s177_s21 = scalar_lea.vmem [#allocation2], %s537_s4  ;;  %s543_s6 = sshll.u32 %s829_s16, 4 }
  0x3e   : > { %s1138_s30 = scalar_select %p980_p11, 1, 0 }
  0x3f   : > { %s186_s1 = sshll.u32 %s177_s21, 4  ;;  %s174_s9 = scalar_lea.sflag [#allocation3], %s929_s27  ;;  %s991_s1 = int_to_ptr.vmem [resolvable:$true] %s186_s1 }
  0x42   : > { %s989_s8 = scalar_lea.hbm %s1139_s0, %s560_s5  ;;  %s692_s5 = scalar_lea.hbm %s1139_s0, 384 }
  0x43   : > { %s687_s11 = scalar_lea.hbm %s989_s8, 128  ;;  %p693_p10 = scmp.lt.u32.totalorder %s989_s8, %s1139_s0 }
  0x44   : > { %p688_p3 = scmp.ne.s32.totalorder %s989_s8, %s687_s11  ;;  %p694_p12 = scmp.lt.u32.totalorder %s692_s5, %s687_s11 }
  0x45   : > { %p696_p2 = scmp.lt.u32.totalorder %s687_s11, %s989_s8 }
  0x46   : > { %p690_p6 = pnand %p688_p3, %p951_p1  ;;  %p695_p0 = por %p694_p12, %p693_p10 }
  0x48   : > { %p691_p7 = pneg %p690_p6  ;;  %p697_p4 = por %p696_p2, %p695_p0 }
  0x4a   : > { %p698_p5 = pnand %p697_p4, %p691_p7 }
  0x4c   : > { %701 = shalt.err (!%p698_p5)
}
  0x4d   : > { %s702_s4 = scalar_lea.vmem %s991_s1, 128  ;;  %s838_s20 = smov [#allocation2]  }
  0x4e   : > { %p703_p8 = scmp.ne.s32.totalorder %s991_s1, %s702_s4  ;;  %s707_s22 = sshll.u32 %s838_s20, 4  ;;  %s708_s22 = int_to_ptr.vmem [resolvable:$false] %s707_s22 }
  0x4f   : > { %s709_s21 = scalar_lea.vmem %s708_s22, 256  ;;  %p710_p6 = scmp.lt.s32.totalorder %s991_s1, %s708_s22 }
  0x50   : > { %p705_p9 = pnand %p703_p8, %p951_p1  ;;  %p711_p11 = scmp.lt.s32.totalorder %s709_s21, %s702_s4 }
  0x52   : > { %p706_p3 = pneg %p705_p9  ;;  %p712_p10 = por %p711_p11, %p710_p6 }
  0x54   : > { %p713_p12 = pnand %p712_p10, %p706_p3 }
  0x56   : > { %716 = shalt.err (!%p713_p12)
}
  0x57   : > { %s1140_s11 = smov 4   ;;  %s1141_s5 = smov 64  }
  0x58   : > { %587 = dma.hbm_to_vmem [thread:$0]  (!%p931_p13), %s989_s8, 128, %s991_s1, %s174_s9, %s1141_s5, %s1141_s5, %s1140_s11  }
  0x59   : > { %s1026_s4 = scalar_lea.hbm %s1121_s2, %s543_s6  ;;  %s221_s20 = scalar_lea.vmem [#allocation7], %s929_s27 }
  0x5a   : > { %s229_s22 = sshll.u32 %s221_s20, 4  ;;  %s717_s21 = scalar_lea.hbm %s1026_s4, 16  ;;  %s230_s22 = int_to_ptr.vmem [resolvable:$true] %s229_s22 }
  0x5b   : > { %p718_p11 = scmp.ne.s32.totalorder %s1026_s4, %s717_s21  ;;  %s722_s8 = scalar_lea.hbm %s1121_s2, 48 }
  0x5c   : > { %p723_p2 = scmp.lt.u32.totalorder %s1026_s4, %s1121_s2  ;;  %p724_p4 = scmp.lt.u32.totalorder %s722_s8, %s717_s21 }
  0x5d   : > { %p720_p7 = pnand %p718_p11, %p951_p1  ;;  %p726_p8 = scmp.lt.u32.totalorder %s717_s21, %s1026_s4 }
  0x5e   : > { %p725_p5 = por %p724_p4, %p723_p2 }
  0x5f   : > { %p721_p0 = pneg %p720_p7 }
  0x60   : > { %p727_p9 = por %p726_p8, %p725_p5 }
  0x62   : > { %p728_p3 = pnand %p727_p9, %p721_p0 }
  0x64   : > { %731 = shalt.err (!%p728_p3)
}
  0x65   : > { %s732_s27 = scalar_lea.vmem %s230_s22, 16  ;;  %s839_s6 = smov [#allocation7]  }
  0x66   : > { %p733_p6 = scmp.ne.s32.totalorder %s230_s22, %s732_s27  ;;  %s737_s5 = sshll.u32 %s839_s6, 4  ;;  %s738_s5 = int_to_ptr.vmem [resolvable:$false] %s737_s5 }
  0x67   : > { %s739_s0 = scalar_lea.vmem %s738_s5, 32  ;;  %p740_p11 = scmp.lt.s32.totalorder %s230_s22, %s738_s5 }
  0x68   : > { %p735_p10 = pnand %p733_p6, %p951_p1  ;;  %p741_p7 = scmp.lt.s32.totalorder %s739_s0, %s732_s27 }
  0x6a   : > { %p736_p12 = pneg %p735_p10  ;;  %p742_p13 = por %p741_p7, %p740_p11 }
  0x6c   : > { %p743_p2 = pnand %p742_p13, %p736_p12 }
  0x6e   : > { %746 = shalt.err (!%p743_p2)
}
  0x6f   : > { %p1142_p4 = scmp.ne.s32.totalorder %s1135_s28, 0  ;;  %p1143_p0 = scmp.ne.s32.totalorder %s1138_s30, 0 }
  0x70   : > { %s1050_s19 = sand.u32 (!%p1143_p0), 1, %s817_s13   ;;  %p1144_p1 = scmp.ne.s32.totalorder (!%p1143_p0), %s1132_s23, 0 }
  0x71   : > { %593 = dma.hbm_to_vmem [thread:$0]  (!%p1142_p4), %s1026_s4, 16, %s230_s22, %s945_s10  }
  0x72   : > { %238 = sbr.rel (%p1143_p0) target bundleno = 367 (0x16f), region = 32  ;;  %s545_s29 = sshll.u32 (!%p1143_p0), %s1050_s19, 3 }
  0x73   : > { %s241_s7 = scalar_lea.sflag (!%p1143_p0), [#allocation3], %s1050_s19  ;;  %s244_s20 = scalar_lea.vmem (!%p1143_p0), [#allocation2], %s545_s29 }
  0x79   : > { %800 = dma.done.wait (%p1144_p1), %s241_s7, 128  }
  0x7a   : > { %802 = vsyncadd (%p1144_p1), %s241_s7, 4294967168  ;;  %s249_s28 = sand.u32 1, %s896_s18   ;;  %s546_s10 = sshll.u32 %s1050_s19, 4 }
  0x7b   : > { %s250_s30 = scalar_lea.sflag [#allocation6], %s249_s28  ;;  %s253_s4 = scalar_lea.vmem [#allocation5], %s546_s10 }
  0x7c   : > { %804 = dma.done.wait (%p1144_p1), %s250_s30, 272  }
  0x7d   : > { %806 = vsyncadd (%p1144_p1), %s250_s30, 4294967024  ;;  %v840_v0 = vmov 0.0   ;;  %vm841_vm0 = vmmov 0   ;;  %v654_v1 = vld [vmem:[%s253_s4] sm:$0xff]   ;;  %v655_v2 = vld [vmem:[%s253_s4 + $0x8] sm:$0xff]   ;;  %vm326_vm1 = vcmask 261120  }
  0x7e   : > { %568 = vmatprep.subr.bf16.mxu0 %v840_v0  ;;  %572 = vmatprep.mubr.msk.bf16.mxu0 %vm841_vm0, %v840_v0  ;;  %v656_v3 = vld [vmem:[%s244_s20] sm:$0xff]   ;;  %s261_s18 = scalar_lea.vmem [#allocation7], %s1050_s19  ;;  %s292_s23 = scalar_lea.vmem [#allocation8], %s545_s29  ;;  %vm379_vm2 = vcmask 257024  }
  0x7f   : > { %569 = vmatpush3.bf16.msra.mxu0 %v654_v1  ;;  %v548_v4 = vld [vmem:[%s261_s18] ss:$0 sm:$0xff]  ;;  %s399_s22 = sshll.u32 %s292_s23, 4  ;;  %s564_s21 = sshll.u32 %s825_s15, 7  ;;  %s1071_s22 = int_to_ptr.vmem [resolvable:$true] %s399_s22 }
  0x80   : > { %570 = vmatprep.subr.bf16.mxu0 %v840_v0  ;;  %s1069_s9 = scalar_lea.hbm %s1122_s3, %s564_s21  ;;  %s383_s11 = scalar_lea.sflag [#allocation4], %s1050_s19 }
  0x81   : > { %s747_s15 = scalar_lea.vmem %s1071_s22, 128  ;;  %p1145_p5 = scmp.ne.s32.totalorder %s1133_s24, 0 }
  0x82   : > { %p748_p13 = scmp.ne.s32.totalorder %s1071_s22, %s747_s15  ;;  %s842_s27 = smov [#allocation8]  }
  0x83   : > { %571 = vmatpush3.bf16.msra.mxu0 %v655_v2  ;;  %s751_s6 = sshll.u32 %s842_s27, 4  ;;  %s752_s6 = int_to_ptr.vmem [resolvable:$false] %s751_s6 }
  0x84   : > { %p749_p8 = pnand %p748_p13, %p1145_p5  ;;  %s753_s5 = scalar_lea.vmem %s752_s6, 256 }
  0x85   : > { %p754_p3 = scmp.lt.s32.totalorder %s1071_s22, %s752_s6  ;;  %p755_p6 = scmp.lt.s32.totalorder %s753_s5, %s747_s15 }
  0x86   : > { %573 = vmatmul.mubr.msk.bf16.vlgmr.msra.gmra.mrb[0].mxu0 %vm326_vm1, %v656_v3  ;;  %p750_p9 = pneg %p749_p8 }
  0x87   : > { %p756_p10 = por %p755_p6, %p754_p3 }
  0x89   : > { %p757_p12 = pnand %p756_p10, %p750_p9 }
 0x159   : > { %v364_v5 = vpop.f32.mrb[0].mxu0 }
 0x15a   : > { %v365_v6 = vadd.f32 %v548_v4, %v364_v5  ;;  %v574_v7 = vpop.f32.mrb[1].mxu0 }
 0x15b   : > { %v367_v8 = vpop.f32.mrb[2].mxu0 }
 0x15c   : > { %v562_v9 = vpack.c.bf16 %v365_v6, %v365_v6  ;;  %v368_v10 = vadd.f32 %v548_v4, %v367_v8  ;;  %v575_v11 = vpop.f32.mrb[3].mxu0 }
 0x15e   : > { %380 = vst.msk [vmem:[%s292_s23] sm:$0xf] %vm379_vm2, %v562_v9  ;;  %v563_v12 = vpack.c.bf16 %v368_v10, %v368_v10 }
 0x160   : > { %381 = vst.msk [vmem:[%s292_s23 + $0x4] sm:$0xf] %vm379_vm2, %v563_v12 }
 0x161   : > { %760 = shalt.err (!%p757_p12)
}
 0x162   : > { %s761_s0 = scalar_lea.hbm %s1069_s9, 128  ;;  %s765_s20 = scalar_lea.hbm %s1122_s3, 384 }
 0x163   : > { %p762_p11 = scmp.ne.s32.totalorder %s1069_s9, %s761_s0  ;;  %p766_p4 = scmp.lt.u32.totalorder %s1069_s9, %s1122_s3 }
 0x164   : > { %p767_p0 = scmp.lt.u32.totalorder %s765_s20, %s761_s0  ;;  %p769_p13 = scmp.lt.u32.totalorder %s761_s0, %s1069_s9 }
 0x165   : > { %p763_p7 = pnand %p762_p11, %p1145_p5 }
 0x166   : > { %p768_p1 = por %p767_p0, %p766_p4 }
 0x167   : > { %p764_p2 = pneg %p763_p7 }
 0x168   : > { %p770_p8 = por %p769_p13, %p768_p1 }
 0x16a   : > { %p771_p9 = pnand %p770_p8, %p764_p2 }
 0x16c   : > { %774 = shalt.err (!%p771_p9)
}
 0x16d   : > { %s843_s30 = smov 64   ;;  %s844_s4 = smov 4  }
 0x16e   : > { %582 = dma.vmem_to_hbm [thread:$0]  (%p1145_p5), %s1071_s22, 128, %s1069_s9, %s383_s11, %s843_s30, %s843_s30, %s844_s4  }
 0x16f PF: > { %p599_p3 = scmp.ge.s32.totalorder %s833_s17, 2  ;;  %s414_s18 = sand.u32 1, %s813_s12  }
 0x170   : > { %p1146_p6 = scmp.ne.s32.totalorder %s1134_s26, 0  ;;  %s415_s23 = scalar_lea.sflag [#allocation4], %s414_s18 }
 0x172   : > { %p595_p10 = pnand %p599_p3, %p1146_p6 }
 0x174   : > { %808 = dma.done.wait (!%p595_p10), %s415_s23, 128  }
 0x175   : > { %810 = vsyncadd (!%p595_p10), %s415_s23, 4294967168  ;;  %s22_s17 = sadd.s32 1, %s833_s17   ;;  %s1147_s24 = sld [smem:[#allocation12_spill]] }
 0x176   : > { %p19_p12 = scmp.ge.s32.totalorder %s22_s17, 5   ;;  %s1148_s12 = smov %s817_s13 }
 0x177   : > { %s1149_s13 = smov %s821_s14  ;;  %s1150_s14 = smov %s921_s25 }
 0x178   : > { %s1151_s15 = smov %s829_s16  ;;  %21 = sbr.rel (!%p19_p12) target bundleno = 11 (0xb), region = 101 }
 0x17b   : > { %s1152_s16 = smov %s1147_s24 }
 0x17f   :  { %420 = vsyncpa [#allocation3], 1 }
 0x180   :  { %422 = vsyncpa [#allocation3 + $0x1], 1 }
 0x181   :  { %423 = vsyncpa [#allocation6], 1 }
 0x182   :  { %425 = vsyncpa [#allocation6 + $0x1], 1 }
 0x183   :  { %426 = vsyncpa [#allocation4], 1 }
 0x184   :  { %428 = vsyncpa [#allocation4 + $0x1], 1 }

</bundles_post_ra>
